<compile_context>
chip_gen: v7x
topology: tpu7x:2x2x1
jax: 0.10.0
libtpu: 0.0.40
codegen_flags: <defaults>
</compile_context>

<pallas_src>
import jax
import jax.numpy as jnp
from jax.experimental import pallas as pl
from jax.experimental.pallas import tpu as pltpu

HIDDEN1 = 400          # logical sizes from the PyTorch module
HIDDEN2 = 300
H1_PAD = 512           # padded to multiples of 128 lanes
H2_PAD = 384


def _round_up(n, m):
    return ((n + m - 1) // m) * m


def _critic_kernel(x_ref, u_ref,
                   w1_ref, b1_ref,
                   w2x_ref, w2u_ref, b2_ref,
                   w3_ref, b3_ref,
                   o_ref):
    # bf16 matmul operands, f32 accumulation (MXU-native).
    x = x_ref[...].astype(jnp.bfloat16)
    u = u_ref[...].astype(jnp.bfloat16)

    # Layer 1: relu(x @ W1 + b1)                      -> [TB, H1_PAD] f32
    h1 = jnp.dot(x, w1_ref[...], preferred_element_type=jnp.float32)
    h1 = jnp.maximum(h1 + b1_ref[...], 0.0)

    # Layer 2: relu(cat([h1,u]) @ W2 + b2) == relu(h1@W2x + u@W2u + b2)
    h2 = jnp.dot(h1.astype(jnp.bfloat16), w2x_ref[...],
                 preferred_element_type=jnp.float32)
    h2 = h2 + jnp.dot(u, w2u_ref[...], preferred_element_type=jnp.float32)
    h2 = jnp.maximum(h2 + b2_ref[...], 0.0)

    # Layer 3: N=1 output — VPU multiply + XLU lane reduce instead of an MXU
    # matmul with 1/256 column utilization.  W3 is stored as a [1, H2_PAD] row.
    w3 = w3_ref[...].astype(jnp.float32)
    q = jnp.sum(h2 * w3, axis=-1, keepdims=True) + b3_ref[0, 0]
    o_ref[...] = q.astype(o_ref.dtype)


def critic_forward(x, u, params, *, block_b=512):
    """Pallas TPU forward for the DDPG Critic.

    x: [B, state_dim] f32, u: [B, action_dim] f32 -> q: [B, 1] f32.
    """
    B, S = x.shape
    _, A = u.shape
    w1, b1, w2x, w2u, b2, w3r, b3 = params

    # Batch tile: at most block_b rows, at least an 8-row sublane multiple.
    TB = min(block_b, _round_up(B, 8))
    B_pad = _round_up(B, TB)
    if B_pad != B:
        x = jnp.pad(x, ((0, B_pad - B), (0, 0)))
        u = jnp.pad(u, ((0, B_pad - B), (0, 0)))
    grid = (B_pad // TB,)

    def batch_spec(d):
        return pl.BlockSpec((TB, d), lambda i: (i, 0))

    def const_spec(shape):
        # Full-array block + constant index map -> stays VMEM-resident.
        return pl.BlockSpec(shape, lambda i: (0, 0))

    flops = 2 * B_pad * (S * H1_PAD + H1_PAD * H2_PAD + A * H2_PAD + H2_PAD)
    bytes_accessed = (
        x.size * 4 + u.size * 4 + B_pad * 4                        # activations
        + (w1.size + w2x.size + w2u.size + w3r.size) * 2           # bf16 weights
        + (b1.size + b2.size + b3.size) * 4)                       # f32 biases

    out = pl.pallas_call(
        _critic_kernel,
        out_shape=jax.ShapeDtypeStruct((B_pad, 1), jnp.float32),
        grid=grid,
        in_specs=[
            batch_spec(S),                                    # x   [TB, S]
            batch_spec(A),                                    # u   [TB, A]
            const_spec(w1.shape),                             # W1  [S, 512]  bf16
            const_spec(b1.shape),                             # b1  [1, 512]  f32
            const_spec(w2x.shape),                            # W2x [512, 384] bf16
            const_spec(w2u.shape),                            # W2u [A, 384]  bf16
            const_spec(b2.shape),                             # b2  [1, 384]  f32
            const_spec(w3r.shape),                            # W3^T [1, 384] bf16
            pl.BlockSpec(memory_space=pltpu.MemorySpace.SMEM),  # b3 [1,1] scalar
        ],
        out_specs=batch_spec(1),
        compiler_params=pltpu.CompilerParams(
            dimension_semantics=("parallel",)),
        cost_estimate=pl.CostEstimate(
            flops=flops, transcendentals=0, bytes_accessed=bytes_accessed),
    )(x, u, w1, b1, w2x, w2u, b2, w3r, b3)
    return out[:B]


def init_critic_params(key, state_dim, action_dim):
    """nn.Linear-style init (U[-1/sqrt(fan_in), +1/sqrt(fan_in)]).

    Returns (padded_bf16_params_for_kernel, raw_f32_params_for_reference).
    """
    ks = jax.random.split(key, 6)

    def lin(kw, kb, fan_in, fan_out):
        bound = 1.0 / jnp.sqrt(jnp.float32(fan_in))
        w = jax.random.uniform(kw, (fan_in, fan_out), jnp.float32, -bound, bound)
        b = jax.random.uniform(kb, (1, fan_out), jnp.float32, -bound, bound)
        return w, b

    w1, b1 = lin(ks[0], ks[1], state_dim, HIDDEN1)
    w2, b2 = lin(ks[2], ks[3], HIDDEN1 + action_dim, HIDDEN2)
    w3, b3 = lin(ks[4], ks[5], HIDDEN2, 1)

    w2x, w2u = w2[:HIDDEN1, :], w2[HIDDEN1:, :]
    p1, p2 = H1_PAD - HIDDEN1, H2_PAD - HIDDEN2

    padded = (
        jnp.pad(w1, ((0, 0), (0, p1))).astype(jnp.bfloat16),    # W1
        jnp.pad(b1, ((0, 0), (0, p1))),                         # b1 (f32)
        jnp.pad(w2x, ((0, p1), (0, p2))).astype(jnp.bfloat16),  # W2x
        jnp.pad(w2u, ((0, 0), (0, p2))).astype(jnp.bfloat16),   # W2u
        jnp.pad(b2, ((0, 0), (0, p2))),                         # b2 (f32)
        jnp.pad(w3.T, ((0, 0), (0, p2))).astype(jnp.bfloat16),  # W3 row [1, 384]
        b3,                                                     # [1, 1] f32 (SMEM)
    )
    raw = (w1, b1, w2, b2, w3, b3)
    return padded, raw


def critic_reference_kernel_precision(x, u, params):
    """Mirrors the kernel's bf16-operand / f32-accumulate math (tight check)."""
    w1, b1, w2x, w2u, b2, w3r, b3 = params
    f = lambda a: a.astype(jnp.float32)
    xb, ub = x.astype(jnp.bfloat16), u.astype(jnp.bfloat16)
    h1 = jnp.maximum(f(xb) @ f(w1) + b1, 0.0)
    h2 = jnp.maximum(f(h1.astype(jnp.bfloat16)) @ f(w2x) + f(ub) @ f(w2u) + b2, 0.0)
    return jnp.sum(h2 * f(w3r), axis=-1, keepdims=True) + b3


def critic_reference_module(x, u, raw):
    """Pure-f32 reference identical to the original PyTorch module."""
    w1, b1, w2, b2, w3, b3 = raw
    h1 = jnp.maximum(x @ w1 + b1, 0.0)
    h2 = jnp.maximum(jnp.concatenate([h1, u], axis=1) @ w2 + b2, 0.0)
    return h2 @ w3 + b3


if __name__ == "__main__":
    key = jax.random.PRNGKey(0)
    k_x, k_u, k_p = jax.random.split(key, 3)

    batch, state_dim, action_dim = 2, 16, 8
    x = jax.random.normal(k_x, (batch, state_dim), jnp.float32)
    u = jax.random.normal(k_u, (batch, action_dim), jnp.float32)
    params, raw = init_critic_params(k_p, state_dim, action_dim)

    q = critic_forward(x, u, params)
    jax.block_until_ready(q)
    assert q.shape == (batch, 1)

    # Tight check vs a reference that mirrors the kernel's bf16/f32 precision.
    q_ref = critic_reference_kernel_precision(x, u, params)
    assert jnp.allclose(q, q_ref, atol=1e-4, rtol=1e-4), (q, q_ref)

    # Looser check vs the exact f32 module semantics (bf16 weights ~0.4% rel).
    q_f32 = critic_reference_module(x, u, raw)
    assert jnp.allclose(q, q_f32, atol=5e-2, rtol=5e-2), (q, q_f32)

    print("KERNEL_OK")
</pallas_src>

<mosaic_0001>
module attributes {stable_mosaic.version = 11 : i64} {
  func.func @_critic_kernel(%arg0: i32, %arg1: memref<8x16xf32, #tpu.memory_space<vmem>>, %arg2: memref<8x8xf32, #tpu.memory_space<vmem>>, %arg3: memref<16x512xbf16, #tpu.memory_space<vmem>>, %arg4: memref<1x512xf32, #tpu.memory_space<vmem>>, %arg5: memref<512x384xbf16, #tpu.memory_space<vmem>>, %arg6: memref<8x384xbf16, #tpu.memory_space<vmem>>, %arg7: memref<1x384xf32, #tpu.memory_space<vmem>>, %arg8: memref<1x384xbf16, #tpu.memory_space<vmem>>, %arg9: memref<1x1xf32, #tpu.memory_space<smem>>, %arg10: memref<8x1xf32, #tpu.memory_space<vmem>>) attributes {dimension_semantics = [#tpu.dimension_semantics<parallel>], iteration_bounds = array<i64: 1>, scalar_prefetch = 0 : i64, scratch_operands = 0 : i64, tpu.core_type = #tpu.core_type<tc>, window_params = [{transform_indices = @transform_0, window_bounds = array<i64: 8, 16>}, {transform_indices = @transform_1, window_bounds = array<i64: 8, 8>}, {pipeline_mode = #tpu.pipeline_mode<synchronous>, transform_indices = @transform_2, window_bounds = array<i64: 16, 512>}, {pipeline_mode = #tpu.pipeline_mode<synchronous>, transform_indices = @transform_3, window_bounds = array<i64: 1, 512>}, {pipeline_mode = #tpu.pipeline_mode<synchronous>, transform_indices = @transform_4, window_bounds = array<i64: 512, 384>}, {pipeline_mode = #tpu.pipeline_mode<synchronous>, transform_indices = @transform_5, window_bounds = array<i64: 8, 384>}, {pipeline_mode = #tpu.pipeline_mode<synchronous>, transform_indices = @transform_6, window_bounds = array<i64: 1, 384>}, {pipeline_mode = #tpu.pipeline_mode<synchronous>, transform_indices = @transform_7, window_bounds = array<i64: 1, 384>}, {transform_indices = @transform_8, window_bounds = array<i64: 1, 1>}, {transform_indices = @transform_9, window_bounds = array<i64: 8, 1>}]} {
    %c0 = arith.constant 0 : index
    %c0_0 = arith.constant 0 : index
    %0 = vector.load %arg1[%c0, %c0_0] : memref<8x16xf32, #tpu.memory_space<vmem>>, vector<8x16xf32>
    %1 = arith.truncf %0 : vector<8x16xf32> to vector<8x16xbf16>
    %c0_1 = arith.constant 0 : index
    %c0_2 = arith.constant 0 : index
    %2 = vector.load %arg2[%c0_1, %c0_2] : memref<8x8xf32, #tpu.memory_space<vmem>>, vector<8x8xf32>
    %3 = arith.truncf %2 : vector<8x8xf32> to vector<8x8xbf16>
    %c0_3 = arith.constant 0 : index
    %c0_4 = arith.constant 0 : index
    %4 = vector.load %arg3[%c0_3, %c0_4] : memref<16x512xbf16, #tpu.memory_space<vmem>>, vector<16x512xbf16>
    %cst = arith.constant dense<0.000000e+00> : vector<8x512xf32>
    %5 = tpu.matmul %1, %4, %cst {dimension_numbers = #tpu.dot_dimension_numbers<[1], [0], [0], [1], [0, 0, 1, 1], [], []>} : vector<8x16xbf16>, vector<16x512xbf16>, vector<8x512xf32> -> vector<8x512xf32>
    %c0_5 = arith.constant 0 : index
    %c0_6 = arith.constant 0 : index
    %6 = vector.load %arg4[%c0_5, %c0_6] : memref<1x512xf32, #tpu.memory_space<vmem>>, vector<1x512xf32>
    %7 = vector.broadcast %6 : vector<1x512xf32> to vector<8x512xf32>
    %8 = arith.addf %5, %7 : vector<8x512xf32>
    %cst_7 = arith.constant 0.000000e+00 : f32
    %9 = vector.broadcast %cst_7 : f32 to vector<8x512xf32>
    %10 = arith.maximumf %8, %9 : vector<8x512xf32>
    %11 = arith.truncf %10 : vector<8x512xf32> to vector<8x512xbf16>
    %c0_8 = arith.constant 0 : index
    %c0_9 = arith.constant 0 : index
    %12 = vector.load %arg5[%c0_8, %c0_9] : memref<512x384xbf16, #tpu.memory_space<vmem>>, vector<512x384xbf16>
    %cst_10 = arith.constant dense<0.000000e+00> : vector<8x384xf32>
    %13 = tpu.matmul %11, %12, %cst_10 {dimension_numbers = #tpu.dot_dimension_numbers<[1], [0], [0], [1], [0, 0, 1, 1], [], []>} : vector<8x512xbf16>, vector<512x384xbf16>, vector<8x384xf32> -> vector<8x384xf32>
    %c0_11 = arith.constant 0 : index
    %c0_12 = arith.constant 0 : index
    %14 = vector.load %arg6[%c0_11, %c0_12] : memref<8x384xbf16, #tpu.memory_space<vmem>>, vector<8x384xbf16>
    %cst_13 = arith.constant dense<0.000000e+00> : vector<8x384xf32>
    %15 = tpu.matmul %3, %14, %cst_13 {dimension_numbers = #tpu.dot_dimension_numbers<[1], [0], [0], [1], [0, 0, 1, 1], [], []>} : vector<8x8xbf16>, vector<8x384xbf16>, vector<8x384xf32> -> vector<8x384xf32>
    %16 = arith.addf %13, %15 : vector<8x384xf32>
    %c0_14 = arith.constant 0 : index
    %c0_15 = arith.constant 0 : index
    %17 = vector.load %arg7[%c0_14, %c0_15] : memref<1x384xf32, #tpu.memory_space<vmem>>, vector<1x384xf32>
    %18 = vector.broadcast %17 : vector<1x384xf32> to vector<8x384xf32>
    %19 = arith.addf %16, %18 : vector<8x384xf32>
    %cst_16 = arith.constant 0.000000e+00 : f32
    %20 = vector.broadcast %cst_16 : f32 to vector<8x384xf32>
    %21 = arith.maximumf %19, %20 : vector<8x384xf32>
    %c0_17 = arith.constant 0 : index
    %c0_18 = arith.constant 0 : index
    %22 = vector.load %arg8[%c0_17, %c0_18] : memref<1x384xbf16, #tpu.memory_space<vmem>>, vector<1x384xbf16>
    %23 = arith.extf %22 : vector<1x384xbf16> to vector<1x384xf32>
    %24 = vector.broadcast %23 : vector<1x384xf32> to vector<8x384xf32>
    %25 = arith.mulf %21, %24 : vector<8x384xf32>
    %cst_19 = arith.constant dense<0.000000e+00> : vector<8xf32>
    %26 = vector.multi_reduction <add>, %25, %cst_19 [1] : vector<8x384xf32> to vector<8xf32>
    %27 = vector.shape_cast %26 : vector<8xf32> to vector<8x1xf32>
    %c0_20 = arith.constant 0 : index
    %c0_21 = arith.constant 0 : index
    %28 = memref.load %arg9[%c0_20, %c0_21] : memref<1x1xf32, #tpu.memory_space<smem>>
    %29 = vector.broadcast %28 : f32 to vector<8x1xf32>
    %30 = arith.addf %27, %29 : vector<8x1xf32>
    %c0_22 = arith.constant 0 : index
    %c0_23 = arith.constant 0 : index
    %31 = vector.load %arg10[%c0_22, %c0_23] : memref<8x1xf32, #tpu.memory_space<vmem>>, vector<8x1xf32>
    tpu.vector_store %arg10[%c0_22, %c0_23], %30 {strides = array<i32>} : memref<8x1xf32, #tpu.memory_space<vmem>>, vector<8x1xf32>,
    return
  }
  func.func @transform_0(%arg0: i32) -> (i32, i32) {
    %c0_i32 = arith.constant 0 : i32
    %c0_i32_0 = arith.constant 0 : i32
    return %arg0, %c0_i32 : i32, i32
  }
  func.func @transform_1(%arg0: i32) -> (i32, i32) {
    %c0_i32 = arith.constant 0 : i32
    %c0_i32_0 = arith.constant 0 : i32
    return %arg0, %c0_i32 : i32, i32
  }
  func.func @transform_2(%arg0: i32) -> (i32, i32) {
    %c0_i32 = arith.constant 0 : i32
    %c0_i32_0 = arith.constant 0 : i32
    %c0_i32_1 = arith.constant 0 : i32
    return %c0_i32, %c0_i32_0 : i32, i32
  }
  func.func @transform_3(%arg0: i32) -> (i32, i32) {
    %c0_i32 = arith.constant 0 : i32
    %c0_i32_0 = arith.constant 0 : i32
    %c0_i32_1 = arith.constant 0 : i32
    return %c0_i32, %c0_i32_0 : i32, i32
  }
  func.func @transform_4(%arg0: i32) -> (i32, i32) {
    %c0_i32 = arith.constant 0 : i32
    %c0_i32_0 = arith.constant 0 : i32
    %c0_i32_1 = arith.constant 0 : i32
    return %c0_i32, %c0_i32_0 : i32, i32
  }
  func.func @transform_5(%arg0: i32) -> (i32, i32) {
    %c0_i32 = arith.constant 0 : i32
    %c0_i32_0 = arith.constant 0 : i32
    %c0_i32_1 = arith.constant 0 : i32
    return %c0_i32, %c0_i32_0 : i32, i32
  }
  func.func @transform_6(%arg0: i32) -> (i32, i32) {
    %c0_i32 = arith.constant 0 : i32
    %c0_i32_0 = arith.constant 0 : i32
    %c0_i32_1 = arith.constant 0 : i32
    return %c0_i32, %c0_i32_0 : i32, i32
  }
  func.func @transform_7(%arg0: i32) -> (i32, i32) {
    %c0_i32 = arith.constant 0 : i32
    %c0_i32_0 = arith.constant 0 : i32
    %c0_i32_1 = arith.constant 0 : i32
    return %c0_i32, %c0_i32_0 : i32, i32
  }
  func.func @transform_8(%arg0: i32) -> (i32, i32) {
    %c0_i32 = arith.constant 0 : i32
    %c0_i32_0 = arith.constant 0 : i32
    %c0_i32_1 = arith.constant 0 : i32
    return %c0_i32, %c0_i32_0 : i32, i32
  }
  func.func @transform_9(%arg0: i32) -> (i32, i32) {
    %c0_i32 = arith.constant 0 : i32
    %c0_i32_0 = arith.constant 0 : i32
    return %arg0, %c0_i32 : i32, i32
  }
}

</mosaic_0001>

<bundles_post_ra>
// kernel: tpu_custom_call.1
= control target key start
LH: loop header
LB: loop body
LE: loop exit
PB: predicated region body
PF: predicated region fallthrough
CT: control target
= control target key end

     0   :  { %15 = vsyncpa [#allocation4], 0  ;;  %s1781_s0 = inlined_call_operand.hbm [shape: f32[8,16], index: 0, kind: input, shape index: {}]   ;;  %s1782_s1 = inlined_call_operand.hbm [shape: f32[8,8], index: 1, kind: input, shape index: {}]   ;;  %s1783_s2 = inlined_call_operand.hbm [shape: bf16[16,512], index: 2, kind: input, shape index: {}]   ;;  %s1784_s3 = inlined_call_operand.vmem [shape: f32[1,512], index: 3, kind: input, shape index: {}]   ;;  %s1785_s4 = inlined_call_operand.hbm [shape: bf16[512,384], index: 4, kind: input, shape index: {}]   ;;  %s1786_s5 = inlined_call_operand.vmem [shape: bf16[8,384], index: 5, kind: input, shape index: {}]   ;;  %s1787_s6 = inlined_call_operand.vmem [shape: f32[1,384], index: 6, kind: input, shape index: {}]   ;;  %s1788_s7 = inlined_call_operand.vmem [shape: bf16[1,384], index: 7, kind: input, shape index: {}]   ;;  %s1789_s8 = inlined_call_operand.<no memory space> [shape: f32[1,1], index: 8, kind: input, shape index: {}]   ;;  %s1790_s9 = inlined_call_operand.vmem [shape: f32[8,1], index: 9, kind: output, shape index: {}]  }
   0x1   :  { %16 = vsyncpa [#allocation6], 0 }
   0x2   :  { %17 = vsyncpa [#allocation9], 0  ;;  %s1610_s30 = smov [#allocation5]   ;;  %s1611_s11 = smov [#allocation3]  }
   0x3   :  { %s34_s10 = sshll.u32 %s1610_s30, 4  ;;  %s24_s12 = sshll.u32 %s1611_s11, 4  ;;  %s35_s10 = int_to_ptr.vmem [resolvable:$true] %s34_s10  ;;  %s25_s12 = int_to_ptr.vmem [resolvable:$true] %s24_s12 }
   0x4   :  { %s1516_s15 = scalar_lea.hbm %s1782_s1, 128 }
   0x5   :  { %p1517_p0 = scmp.ne.s32.totalorder %s1782_s1, %s1516_s15  ;;  %p1520_p1 = scmp.lt.u32.totalorder %s1516_s15, %s1782_s1 }
   0x7   :  { %p1522_p2 = pnand %p1520_p1, %p1517_p0 }
   0x9   :  { %1525 = shalt.err (!%p1522_p2)
}
   0xa   :  { %s1526_s20 = scalar_lea.vmem %s35_s10, 128  ;;  %p1531_p4 = scmp.lt.s32.totalorder %s35_s10, %s35_s10 }
   0xb   :  { %p1527_p3 = scmp.ne.s32.totalorder %s35_s10, %s1526_s20  ;;  %p1532_p5 = scmp.lt.s32.totalorder %s1526_s20, %s1526_s20 }
   0xd   :  { %p1533_p6 = por %p1532_p5, %p1531_p4 }
   0xf   :  { %p1534_p7 = pnand %p1533_p6, %p1527_p3 }
  0x11   :  { %1537 = shalt.err (!%p1534_p7)
}
  0x12   :  { %37 = dma.hbm_to_vmem [thread:$0]  %s1782_s1, 128, %s35_s10, [#allocation6]  }
  0x13   :  { %s1538_s25 = scalar_lea.hbm %s1781_s0, 128 }
  0x14   :  { %p1539_p8 = scmp.ne.s32.totalorder %s1781_s0, %s1538_s25  ;;  %p1542_p9 = scmp.lt.u32.totalorder %s1538_s25, %s1781_s0 }
  0x16   :  { %p1544_p10 = pnand %p1542_p9, %p1539_p8 }
  0x18   :  { %1547 = shalt.err (!%p1544_p10)
}
  0x19   :  { %s1548_s30 = scalar_lea.vmem %s25_s12, 128  ;;  %p1553_p12 = scmp.lt.s32.totalorder %s25_s12, %s25_s12 }
  0x1a   :  { %p1549_p11 = scmp.ne.s32.totalorder %s25_s12, %s1548_s30  ;;  %p1554_p13 = scmp.lt.s32.totalorder %s1548_s30, %s1548_s30 }
  0x1c   :  { %p1555_p0 = por %p1554_p13, %p1553_p12 }
  0x1e   :  { %p1556_p1 = pnand %p1555_p0, %p1549_p11 }
  0x20   :  { %1559 = shalt.err (!%p1556_p1)
}
  0x21   :  { %27 = dma.hbm_to_vmem [thread:$0]  %s1781_s0, 128, %s25_s12, [#allocation4]  }
  0x22   :  { %s1612_s11 = smov [#allocation7]   ;;  %s1560_s16 = scalar_lea.hbm %s1783_s2, 512 }
  0x23   :  { %s43_s13 = sshll.u32 %s1612_s11, 4  ;;  %p1561_p2 = scmp.ne.s32.totalorder %s1783_s2, %s1560_s16  ;;  %s44_s13 = int_to_ptr.vmem [resolvable:$true] %s43_s13 }
  0x24   :  { %p1564_p3 = scmp.lt.u32.totalorder %s1560_s16, %s1783_s2 }
  0x26   :  { %p1566_p4 = pnand %p1564_p3, %p1561_p2 }
  0x28   :  { %1569 = shalt.err (!%p1566_p4)
}
  0x29   :  { %s1570_s21 = scalar_lea.vmem %s44_s13, 512  ;;  %p1575_p6 = scmp.lt.s32.totalorder %s44_s13, %s44_s13 }
  0x2a   :  { %p1571_p5 = scmp.ne.s32.totalorder %s44_s13, %s1570_s21  ;;  %p1576_p7 = scmp.lt.s32.totalorder %s1570_s21, %s1570_s21 }
  0x2c   :  { %p1577_p8 = por %p1576_p7, %p1575_p6 }
  0x2e   :  { %p1578_p9 = pnand %p1577_p8, %p1571_p5 }
  0x30   :  { %1581 = shalt.err (!%p1578_p9)
}
  0x31   :  { %s1613_s0 = smov 256   ;;  %s1614_s12 = smov 16  }
  0x32   :  { %49 = dma.hbm_to_vmem [thread:$0]  %s1783_s2, 512, %s44_s13, [#allocation6], %s1613_s0, %s1613_s0, %s1614_s12  }
  0x33   :  { %s1615_s24 = smov [#allocation8]   ;;  %s1582_s28 = scalar_lea.hbm %s1785_s4, 12288 }
  0x34   :  { %s57_s25 = sshll.u32 %s1615_s24, 4  ;;  %p1583_p10 = scmp.ne.s32.totalorder %s1785_s4, %s1582_s28  ;;  %s58_s25 = int_to_ptr.vmem [resolvable:$true] %s57_s25 }
  0x35   :  { %p1586_p11 = scmp.lt.u32.totalorder %s1582_s28, %s1785_s4 }
  0x37   :  { %p1588_p12 = pnand %p1586_p11, %p1583_p10 }
  0x39   :  { %1591 = shalt.err (!%p1588_p12)
}
  0x3a   :  { %s1592_s11 = scalar_lea.vmem %s58_s25, 12288  ;;  %p1597_p0 = scmp.lt.s32.totalorder %s58_s25, %s58_s25 }
  0x3b   :  { %p1593_p13 = scmp.ne.s32.totalorder %s58_s25, %s1592_s11  ;;  %p1598_p1 = scmp.lt.s32.totalorder %s1592_s11, %s1592_s11 }
  0x3d   :  { %p1599_p2 = por %p1598_p1, %p1597_p0 }
  0x3f   :  { %p1600_p3 = pnand %p1599_p2, %p1593_p13 }
  0x41   :  { %1603 = shalt.err (!%p1600_p3)
}
  0x42   :  { %s1616_s2 = smov 192   ;;  %s1617_s13 = smov 12  }
  0x43   :  { %63 = dma.hbm_to_vmem [thread:$0]  %s1785_s4, 12288, %s58_s25, [#allocation9], %s1616_s2, %s1616_s2, %s1617_s13  }
  0x44   :  { %1604 = dma.done.wait [#allocation4], 128  }
  0x45   :  { %1605 = vsyncadd [#allocation4], 4294967168 }
  0x46   :  { %1606 = dma.done.wait [#allocation6], 640  }
  0x47   :  { %1607 = vsyncadd [#allocation6], 4294966656 }
  0x48   :  { %1608 = dma.done.wait [#allocation9], 12288  }
  0x49   :  { %1609 = vsyncadd [#allocation9], 4294955008  ;;  %v1618_v0 = vmov 0   ;;  %v1379_v1 = vld [vmem:[#allocation7 + $0x4] ss:$16 sps:$4 sm:$0xff]   ;;  %vm371_vm0 = vcmask 1043456  }
  0x4a   :  { %171 = vmatprep.mubr.bf16.mxu0 %v1618_v0  ;;  %212 = vmatprep.mubr.bf16.mxu1 %v1618_v0  ;;  %v1381_v2 = vld [vmem:[#allocation7 + $0xc] ss:$16 sps:$4 sm:$0xff]   ;;  %v1383_v3 = vld [vmem:[#allocation7] ss:$16 sps:$4 sm:$0xff]   ;;  %v1384_v4 = vld [vmem:[#allocation7 + $0x8] ss:$16 sps:$4 sm:$0xff]  }
  0x4b   :  { %139 = vmatprep.subr.bf16.mxu0 %v1379_v1  ;;  %v85_v5 = vld [vmem:[#allocation3] sm:$0xff]  ;;  %180 = vmatprep.subr.bf16.mxu1 %v1381_v2  ;;  %v1387_v8 = vld [vmem:[%s1786_s5 + $0x8] ss:$0 sps:$4 sm:$0xff]   ;;  %vm135_vm1 = vcmask 130048   ;;  %v1619_v11 = vmov 0.0   ;;  %vm1620_vm2 = vmmov 0  }
  0x4c   :  { %v86_v6 = vpack.c.bf16 %v85_v5, %v85_v5  ;;  %v357_v7 = vld [vmem:[%s1786_s5] sm:$0xff]  ;;  %140 = vmatpush1.bf16.msra.mxu0 %v1383_v3  ;;  %181 = vmatpush1.bf16.msra.mxu1 %v1384_v4  ;;  %v379_v12 = vsel %vm371_vm0, %v1387_v8, 0  ;;  %v87_v16 = vld [vmem:[#allocation5] sm:$0xff]  ;;  %v1388_v18 = vld [vmem:[#allocation8] ss:$12 sps:$4 sm:$0xff]   ;;  %vm367_vm3 = vcmask 64512  }
  0x4d   :  { %v1215_v9 = vcombine.high %v357_v7, %v357_v7  ;;  %v1214_v10 = vcombine.low %v357_v7, %v357_v7  ;;  %1362 = vmatprep.subr.bf16.mxu1 %v1619_v11  ;;  %v1390_v14 = vld [vmem:[#allocation8 + $0x4] ss:$12 sps:$4 sm:$0xff]   ;;  %v88_v17 = vpack.c.bf16 %v87_v16, %v87_v16  ;;  %v1391_v19 = vld [vmem:[#allocation8 + $0x180] ss:$12 sps:$4 sm:$0xff]   ;;  %v1396_v20 = vld [vmem:[#allocation8 + $0x1c] ss:$12 sps:$4 sm:$0xff]  }
  0x4e   :  { %v1393_v15 = vld [vmem:[#allocation8 + $0x184] ss:$12 sps:$4 sm:$0xff]   ;;  %v1399_v21 = vld [vmem:[#allocation8 + $0x19c] ss:$12 sps:$4 sm:$0xff]   ;;  %v1402_v24 = vld [vmem:[#allocation8 + $0x34] ss:$12 sps:$4 sm:$0xff]  }
  0x4f   :  { %1217 = vmatprep.subr.msk.bf16.mxu0 %vm371_vm0, %v1215_v9  ;;  %v373_v13 = vsel %vm371_vm0, %v1214_v10, 0  ;;  %1212 = vmatmul.mubr.msk.bf16.vlgmr.msra.gmra.mrb[0].mxu0 %vm135_vm1, %v86_v6  ;;  %v1394_v22 = vld [vmem:[#allocation8 + $0x18] ss:$12 sps:$4 sm:$0xff]   ;;  %v1405_v25 = vld [vmem:[#allocation8 + $0x1b4] ss:$12 sps:$4 sm:$0xff]   ;;  %vm1199_vm4 = vcmask 7168  }
  0x50   :  { %1213 = vmatmul.mubr.msk.bf16.vlgmr.msra.gmra.mrb[0].mxu1 %vm135_vm1, %v86_v6  ;;  %382 = vmatpush1.bf16.msra.mxu0 %v373_v13  ;;  %v1397_v23 = vld [vmem:[#allocation8 + $0x198] ss:$12 sps:$4 sm:$0xff]   ;;  %v1400_v26 = vld [vmem:[#allocation8 + $0x30] ss:$12 sps:$4 sm:$0xff]   ;;  %v1406_v30 = vld [vmem:[#allocation8 + $0x48] ss:$12 sps:$4 sm:$0xff]  }
  0x51   :  { %1363 = vmatpush3.bf16.msra.mxu1 %v379_v12  ;;  %413 = vmatprep.mubr.bf16.mxu0 %v1618_v0  ;;  %v1403_v27 = vld [vmem:[#allocation8 + $0x1b0] ss:$12 sps:$4 sm:$0xff]   ;;  %v1408_v28 = vld [vmem:[#allocation8 + $0x4c] ss:$12 sps:$4 sm:$0xff]   ;;  %v1409_v31 = vld [vmem:[#allocation8 + $0x1c8] ss:$12 sps:$4 sm:$0xff]  }
  0x52   :  { %1364 = vmatprep.mubr.msk.bf16.mxu1 %vm1620_vm2, %v1619_v11  ;;  %974 = vmatprep.subr.bf16.mxu0 %v1390_v14  ;;  %v1411_v29 = vld [vmem:[#allocation8 + $0x1cc] ss:$12 sps:$4 sm:$0xff]   ;;  %v1414_v32 = vld [vmem:[#allocation8 + $0x64] ss:$12 sps:$4 sm:$0xff]   ;;  %v1420_v36 = vld [vmem:[#allocation8 + $0x7c] ss:$12 sps:$4 sm:$0xff]  }
  0x53   :  { %1015 = vmatprep.subr.bf16.mxu1 %v1393_v15  ;;  %v1417_v33 = vld [vmem:[#allocation8 + $0x1e4] ss:$12 sps:$4 sm:$0xff]   ;;  %v1412_v34 = vld [vmem:[#allocation8 + $0x60] ss:$12 sps:$4 sm:$0xff]   ;;  %v1423_v37 = vld [vmem:[#allocation8 + $0x1fc] ss:$12 sps:$4 sm:$0xff]  }
  0x54   :  { %v1415_v35 = vld [vmem:[#allocation8 + $0x1e0] ss:$12 sps:$4 sm:$0xff]   ;;  %v1418_v38 = vld [vmem:[#allocation8 + $0x78] ss:$12 sps:$4 sm:$0xff]   ;;  %v1424_v42 = vld [vmem:[#allocation8 + $0x90] ss:$12 sps:$4 sm:$0xff]  }
  0x55   :  { %v1421_v39 = vld [vmem:[#allocation8 + $0x1f8] ss:$12 sps:$4 sm:$0xff]   ;;  %v1426_v40 = vld [vmem:[#allocation8 + $0x94] ss:$12 sps:$4 sm:$0xff]   ;;  %v1427_v43 = vld [vmem:[#allocation8 + $0x210] ss:$12 sps:$4 sm:$0xff]  }
  0x56   :  { %v1429_v41 = vld [vmem:[#allocation8 + $0x214] ss:$12 sps:$4 sm:$0xff]   ;;  %v1432_v44 = vld [vmem:[#allocation8 + $0xac] ss:$12 sps:$4 sm:$0xff]   ;;  %v1438_v48 = vld [vmem:[#allocation8 + $0xc4] ss:$12 sps:$4 sm:$0xff]  }
  0x57   :  { %1218 = vmatmul.mubr.msk.bf16.vlgmr.msra.gmra.mrb[4].mxu0 %vm367_vm3, %v88_v17  ;;  %v1435_v45 = vld [vmem:[#allocation8 + $0x22c] ss:$12 sps:$4 sm:$0xff]   ;;  %v1430_v46 = vld [vmem:[#allocation8 + $0xa8] ss:$12 sps:$4 sm:$0xff]   ;;  %v1441_v49 = vld [vmem:[#allocation8 + $0x244] ss:$12 sps:$4 sm:$0xff]  }
  0x58   :  { %1365 = vmatmul.mubr.msk.bf16.vlgmr.msra.gmra.mrb[4].mxu1 %vm367_vm3, %v88_v17  ;;  %975 = vmatpush1.bf16.msra.mxu0 %v1388_v18  ;;  %v1433_v47 = vld [vmem:[#allocation8 + $0x228] ss:$12 sps:$4 sm:$0xff]   ;;  %v1436_v50 = vld [vmem:[#allocation8 + $0xc0] ss:$12 sps:$4 sm:$0xff]   ;;  %v1442_v54 = vld [vmem:[#allocation8 + $0xd8] ss:$12 sps:$4 sm:$0xff]   ;;  %v95_v18 = vlaneseq }
  0x59   :  { %1016 = vmatpush1.bf16.msra.mxu1 %v1391_v19  ;;  %976 = vmatprep.subr.bf16.mxu0 %v1396_v20  ;;  %v1439_v51 = vld [vmem:[#allocation8 + $0x240] ss:$12 sps:$4 sm:$0xff]   ;;  %v1444_v52 = vld [vmem:[#allocation8 + $0xdc] ss:$12 sps:$4 sm:$0xff]   ;;  %v1445_v55 = vld [vmem:[#allocation8 + $0x258] ss:$12 sps:$4 sm:$0xff]  }
  0x5a   :  { %1017 = vmatprep.subr.bf16.mxu1 %v1399_v21  ;;  %v1447_v53 = vld [vmem:[#allocation8 + $0x25c] ss:$12 sps:$4 sm:$0xff]   ;;  %v1450_v56 = vld [vmem:[#allocation8 + $0xf4] ss:$12 sps:$4 sm:$0xff]   ;;  %v1456_v60 = vld [vmem:[#allocation8 + $0x10c] ss:$12 sps:$4 sm:$0xff]  }
  0x5b   :  { %v1453_v57 = vld [vmem:[#allocation8 + $0x274] ss:$12 sps:$4 sm:$0xff]   ;;  %v1448_v58 = vld [vmem:[#allocation8 + $0xf0] ss:$12 sps:$4 sm:$0xff]   ;;  %v1459_v61 = vld [vmem:[#allocation8 + $0x28c] ss:$12 sps:$4 sm:$0xff]  }
  0x5c   :  { %977 = vmatpush1.bf16.msra.mxu0 %v1394_v22  ;;  %v1451_v59 = vld [vmem:[#allocation8 + $0x270] ss:$12 sps:$4 sm:$0xff]   ;;  %v1454_v62 = vld [vmem:[#allocation8 + $0x108] ss:$12 sps:$4 sm:$0xff]   ;;  %v1460_v2 = vld [vmem:[#allocation8 + $0x120] ss:$12 sps:$4 sm:$0xff]  }
  0x5d   :  { %1018 = vmatpush1.bf16.msra.mxu1 %v1397_v23  ;;  %978 = vmatprep.subr.bf16.mxu0 %v1402_v24  ;;  %v1457_v63 = vld [vmem:[#allocation8 + $0x288] ss:$12 sps:$4 sm:$0xff]   ;;  %v1462_v0 = vld [vmem:[#allocation8 + $0x124] ss:$12 sps:$4 sm:$0xff]   ;;  %v1463_v3 = vld [vmem:[#allocation8 + $0x2a0] ss:$12 sps:$4 sm:$0xff]  }
  0x5e   :  { %1019 = vmatprep.subr.bf16.mxu1 %v1405_v25  ;;  %v1465_v1 = vld [vmem:[#allocation8 + $0x2a4] ss:$12 sps:$4 sm:$0xff]   ;;  %v1468_v4 = vld [vmem:[#allocation8 + $0x13c] ss:$12 sps:$4 sm:$0xff]   ;;  %v1474_v8 = vld [vmem:[#allocation8 + $0x154] ss:$12 sps:$4 sm:$0xff]  }
  0x5f   :  { %v1471_v5 = vld [vmem:[#allocation8 + $0x2bc] ss:$12 sps:$4 sm:$0xff]   ;;  %v1466_v6 = vld [vmem:[#allocation8 + $0x138] ss:$12 sps:$4 sm:$0xff]   ;;  %v1477_v9 = vld [vmem:[#allocation8 + $0x2d4] ss:$12 sps:$4 sm:$0xff]  }
  0x60   :  { %979 = vmatpush1.bf16.msra.mxu0 %v1400_v26  ;;  %v1469_v7 = vld [vmem:[#allocation8 + $0x2b8] ss:$12 sps:$4 sm:$0xff]   ;;  %v1472_v10 = vld [vmem:[#allocation8 + $0x150] ss:$12 sps:$4 sm:$0xff]   ;;  %v1478_v14 = vld [vmem:[#allocation8 + $0x168] ss:$12 sps:$4 sm:$0xff]  }
  0x61   :  { %1020 = vmatpush1.bf16.msra.mxu1 %v1403_v27  ;;  %980 = vmatprep.subr.bf16.mxu0 %v1408_v28  ;;  %v1475_v11 = vld [vmem:[#allocation8 + $0x2d0] ss:$12 sps:$4 sm:$0xff]   ;;  %v1480_v12 = vld [vmem:[#allocation8 + $0x16c] ss:$12 sps:$4 sm:$0xff]   ;;  %v1481_v15 = vld [vmem:[#allocation8 + $0x2e8] ss:$12 sps:$4 sm:$0xff]  }
  0x62   :  { %1021 = vmatprep.subr.bf16.mxu1 %v1411_v29  ;;  %v1483_v13 = vld [vmem:[#allocation8 + $0x2ec] ss:$12 sps:$4 sm:$0xff]   ;;  %v1484_v16 = vld [vmem:[#allocation8 + $0xc8] ss:$12 sps:$4 sm:$0xff]   ;;  %v1725_v19 = vshrl.u32 %v95_v18, 7 }
  0x63   :  { %v1485_v17 = vld [vmem:[#allocation8 + $0x248] ss:$12 sps:$4 sm:$0xff]   ;;  %v93_v22 = vld [vmem:[%s1784_s3] sm:$0xf]  ;;  %v1511_v18 = vld [vmem:[#allocation8 + $0x218] ss:$12 sps:$4 sm:$0xff]  }
  0x64   :  { %981 = vmatpush1.bf16.msra.mxu0 %v1406_v30  ;;  %v1728_v20 = vsub.s32 0, %v1725_v19  ;;  %v1731_v21 = vsub.s32 2, %v1725_v19  ;;  %v101_v23 = vsub.s32 1, %v1725_v19  ;;  %v109_v24 = vsub.s32 3, %v1725_v19 }
  0x65   :  { %1022 = vmatpush1.bf16.msra.mxu1 %v1409_v31  ;;  %982 = vmatprep.subr.bf16.mxu0 %v1414_v32 }
  0x66   :  { %1023 = vmatprep.subr.bf16.mxu1 %v1417_v33  ;;  %v98_v25 = vrot.slane %v93_v22, %v1728_v20  ;;  %v106_v26 = vrot.slane %v93_v22, %v1731_v21  ;;  %v102_v27 = vrot.slane %v93_v22, %v101_v23  ;;  %v110_v28 = vrot.slane %v93_v22, %v109_v24  ;;  %v1512_v22 = vld [vmem:[#allocation8 + $0x170] ss:$12 sps:$4 sm:$0xff]  }
  0x67   :  { %v1513_v24 = vld [vmem:[#allocation8 + $0x2f0] ss:$12 sps:$4 sm:$0xff]  }
  0x68   :  { %983 = vmatpush1.bf16.msra.mxu0 %v1412_v34 }
  0x69   :  { %1024 = vmatpush1.bf16.msra.mxu1 %v1415_v35  ;;  %984 = vmatprep.subr.bf16.mxu0 %v1420_v36 }
  0x6a   :  { %1025 = vmatprep.subr.bf16.mxu1 %v1423_v37 }
  0x6c   :  { %985 = vmatpush1.bf16.msra.mxu0 %v1418_v38 }
  0x6d   :  { %1026 = vmatpush1.bf16.msra.mxu1 %v1421_v39  ;;  %986 = vmatprep.subr.bf16.mxu0 %v1426_v40 }
  0x6e   :  { %1027 = vmatprep.subr.bf16.mxu1 %v1429_v41 }
  0x70   :  { %987 = vmatpush1.bf16.msra.mxu0 %v1424_v42 }
  0x71   :  { %1028 = vmatpush1.bf16.msra.mxu1 %v1427_v43  ;;  %988 = vmatprep.subr.bf16.mxu0 %v1432_v44 }
  0x72   :  { %1029 = vmatprep.subr.bf16.mxu1 %v1435_v45 }
  0x74   :  { %989 = vmatpush1.bf16.msra.mxu0 %v1430_v46 }
  0x75   :  { %1030 = vmatpush1.bf16.msra.mxu1 %v1433_v47  ;;  %990 = vmatprep.subr.bf16.mxu0 %v1438_v48  ;;  %v1486_v48 = vld [vmem:[#allocation8 + $0x8] ss:$12 sps:$4 sm:$0xff]  }
  0x76   :  { %1031 = vmatprep.subr.bf16.mxu1 %v1441_v49  ;;  %v1487_v49 = vld [vmem:[#allocation8 + $0x188] ss:$12 sps:$4 sm:$0xff]  }
  0x78   :  { %991 = vmatpush1.bf16.msra.mxu0 %v1436_v50 }
  0x79   :  { %1032 = vmatpush1.bf16.msra.mxu1 %v1439_v51  ;;  %992 = vmatprep.subr.bf16.mxu0 %v1444_v52  ;;  %v1488_v51 = vld [vmem:[#allocation8 + $0xe0] ss:$12 sps:$4 sm:$0xff]  }
  0x7a   :  { %1033 = vmatprep.subr.bf16.mxu1 %v1447_v53  ;;  %v1489_v52 = vld [vmem:[#allocation8 + $0x260] ss:$12 sps:$4 sm:$0xff]  }
  0x7c   :  { %993 = vmatpush1.bf16.msra.mxu0 %v1442_v54 }
  0x7d   :  { %1034 = vmatpush1.bf16.msra.mxu1 %v1445_v55  ;;  %994 = vmatprep.subr.bf16.mxu0 %v1450_v56 }
  0x7e   :  { %1035 = vmatprep.subr.bf16.mxu1 %v1453_v57  ;;  %v1490_v57 = vld [vmem:[#allocation8 + $0x20] ss:$12 sps:$4 sm:$0xff]  }
  0x80   :  { %995 = vmatpush1.bf16.msra.mxu0 %v1448_v58  ;;  %v1491_v58 = vld [vmem:[#allocation8 + $0x1a0] ss:$12 sps:$4 sm:$0xff]  }
  0x81   :  { %1036 = vmatpush1.bf16.msra.mxu1 %v1451_v59  ;;  %996 = vmatprep.subr.bf16.mxu0 %v1456_v60 }
  0x82   :  { %1037 = vmatprep.subr.bf16.mxu1 %v1459_v61  ;;  %v1492_v61 = vld [vmem:[#allocation8 + $0xf8] ss:$12 sps:$4 sm:$0xff]  }
  0x84   :  { %997 = vmatpush1.bf16.msra.mxu0 %v1454_v62  ;;  %v1493_v62 = vld [vmem:[#allocation8 + $0x278] ss:$12 sps:$4 sm:$0xff]  }
  0x85   :  { %1038 = vmatpush1.bf16.msra.mxu1 %v1457_v63  ;;  %998 = vmatprep.subr.bf16.mxu0 %v1462_v0 }
  0x86   :  { %1039 = vmatprep.subr.bf16.mxu1 %v1465_v1  ;;  %v1494_v1 = vld [vmem:[#allocation8 + $0x38] ss:$12 sps:$4 sm:$0xff]  }
  0x88   :  { %999 = vmatpush1.bf16.msra.mxu0 %v1460_v2  ;;  %v1495_v2 = vld [vmem:[#allocation8 + $0x1b8] ss:$12 sps:$4 sm:$0xff]  }
  0x89   :  { %1040 = vmatpush1.bf16.msra.mxu1 %v1463_v3  ;;  %1000 = vmatprep.subr.bf16.mxu0 %v1468_v4  ;;  %v1496_v3 = vld [vmem:[#allocation8 + $0x110] ss:$12 sps:$4 sm:$0xff]  }
  0x8a   :  { %1041 = vmatprep.subr.bf16.mxu1 %v1471_v5  ;;  %v1497_v4 = vld [vmem:[#allocation8 + $0x290] ss:$12 sps:$4 sm:$0xff]  }
  0x8b   :  { %v1498_v5 = vld [vmem:[#allocation8 + $0x50] ss:$12 sps:$4 sm:$0xff]  }
  0x8c   :  { %1001 = vmatpush1.bf16.msra.mxu0 %v1466_v6  ;;  %v1499_v6 = vld [vmem:[#allocation8 + $0x1d0] ss:$12 sps:$4 sm:$0xff]  }
  0x8d   :  { %1042 = vmatpush1.bf16.msra.mxu1 %v1469_v7  ;;  %1002 = vmatprep.subr.bf16.mxu0 %v1474_v8  ;;  %v1500_v7 = vld [vmem:[#allocation8 + $0x128] ss:$12 sps:$4 sm:$0xff]  }
  0x8e   :  { %1043 = vmatprep.subr.bf16.mxu1 %v1477_v9  ;;  %v1501_v8 = vld [vmem:[#allocation8 + $0x2a8] ss:$12 sps:$4 sm:$0xff]  }
  0x8f   :  { %v1502_v9 = vld [vmem:[#allocation8 + $0x68] ss:$12 sps:$4 sm:$0xff]  }
  0x90   :  { %1003 = vmatpush1.bf16.msra.mxu0 %v1472_v10  ;;  %v1503_v10 = vld [vmem:[#allocation8 + $0x1e8] ss:$12 sps:$4 sm:$0xff]  }
  0x91   :  { %1044 = vmatpush1.bf16.msra.mxu1 %v1475_v11  ;;  %1004 = vmatprep.subr.bf16.mxu0 %v1480_v12  ;;  %v1504_v11 = vld [vmem:[#allocation8 + $0x140] ss:$12 sps:$4 sm:$0xff]  }
  0x92   :  { %1045 = vmatprep.subr.bf16.mxu1 %v1483_v13  ;;  %v1505_v12 = vld [vmem:[#allocation8 + $0x2c0] ss:$12 sps:$4 sm:$0xff]  }
  0x93   :  { %v1506_v13 = vld [vmem:[#allocation8 + $0x80] ss:$12 sps:$4 sm:$0xff]  }
  0x94   :  { %1005 = vmatpush1.bf16.msra.mxu0 %v1478_v14  ;;  %v1507_v14 = vld [vmem:[#allocation8 + $0x200] ss:$12 sps:$4 sm:$0xff]  }
  0x95   :  { %1046 = vmatpush1.bf16.msra.mxu1 %v1481_v15  ;;  %1318 = vmatprep.subr.bf16.mxu0 %v1484_v16  ;;  %v1508_v15 = vld [vmem:[#allocation8 + $0x158] ss:$12 sps:$4 sm:$0xff]  }
  0x96   :  { %1340 = vmatprep.subr.bf16.mxu1 %v1485_v17  ;;  %v1509_v16 = vld [vmem:[#allocation8 + $0x2d8] ss:$12 sps:$4 sm:$0xff]  }
  0x97   :  { %v1510_v17 = vld [vmem:[#allocation8 + $0x98] ss:$12 sps:$4 sm:$0xff]  }
 0x122   :  { %v173_v29 = vpop.f32.mrb[0].mxu0 }
 0x123   :  { %v214_v30 = vpop.f32.mrb[0].mxu1  ;;  %v174_v31 = vadd.f32 %v173_v29, %v98_v25  ;;  %v175_v33 = vpop.f32.mrb[1].mxu0  ;;  %v1514_v25 = vld [vmem:[#allocation8 + $0xb0] ss:$12 sps:$4 sm:$0xff]  }
 0x124   :  { %v215_v32 = vadd.f32 %v214_v30, %v106_v26  ;;  %v216_v34 = vpop.f32.mrb[1].mxu1  ;;  %v176_v35 = vadd.f32 %v175_v33, %v102_v27  ;;  %v177_v37 = vpop.f32.mrb[2].mxu0  ;;  %v1515_v26 = vld [vmem:[#allocation8 + $0x230] ss:$12 sps:$4 sm:$0xff]  }
 0x125   :  { %v217_v36 = vadd.f32 %v216_v34, %v110_v28  ;;  %v218_v38 = vpop.f32.mrb[2].mxu1  ;;  %v221_v39 = vmax.f32 %v174_v31, 0.0  ;;  %v178_v41 = vpop.f32.mrb[3].mxu0  ;;  %v1159_v27 = vld [vmem:[%s1788_s7] sm:$0x7] }
 0x126   :  { %v223_v40 = vmax.f32 %v215_v32, 0.0  ;;  %v219_v42 = vpop.f32.mrb[3].mxu1  ;;  %v222_v43 = vmax.f32 %v176_v35, 0.0  ;;  %v1160_v28 = vunpack.c.l.bf16 %v1159_v27  ;;  %v1136_v29 = vld [vmem:[%s1787_s6] sm:$0x7] }
 0x127   :  { %v224_v44 = vmax.f32 %v217_v36, 0.0  ;;  %v1744_v50 = vpack.c.bf16 %v221_v39, %v221_v39  ;;  %v1141_v33 = vrot.slane %v1136_v29, %v1728_v20  ;;  %v1145_v38 = vrot.slane %v1136_v29, %v101_v23 }
 0x128   :  { %v1742_v45 = vpack.c.bf16 %v223_v40, %v223_v40  ;;  %v226_v46 = vpack.c.bf16 %v222_v43, %v222_v43  ;;  %v1165_v36 = vrot.slane %v1160_v28, %v1728_v20  ;;  %v1169_v41 = vrot.slane %v1160_v28, %v1731_v21 }
 0x129   :  { %v228_v47 = vpack.c.bf16 %v224_v44, %v224_v44 }
 0x12a   :  { %1006 = vmatprep.mubr.bf16.mxu0 %v226_v46  ;;  %v1746_v53 = vpop.f32.mrb[4].mxu0 }
 0x12b   :  { %1047 = vmatprep.mubr.bf16.mxu1 %v228_v47  ;;  %v1748_v54 = vpop.f32.mrb[4].mxu1  ;;  %1007 = vmatmul.mubr.bf16.vlgmr.msra.gmra.mrb[8].mxu0 %v1744_v50  ;;  %v1752_v55 = vpop.f32.mrb[5].mxu0 }
 0x12c   :  { %1048 = vmatmul.mubr.bf16.vlgmr.msra.gmra.mrb[8].mxu1 %v1742_v45  ;;  %v1366_v56 = vpop.f32.mrb[5].mxu1  ;;  %1319 = vmatpush3.bf16.msra.mxu0 %v1486_v48  ;;  %v419_v59 = vpop.f32.mrb[6].mxu0 }
 0x12d   :  { %1341 = vmatpush3.bf16.msra.mxu1 %v1487_v49  ;;  %v459_v60 = vpop.f32.mrb[6].mxu1  ;;  %1088 = vmatprep.mubr.bf16.mxu0 %v226_v46  ;;  %v420_v63 = vpop.f32.mrb[7].mxu0  ;;  %v1184_v49 = vrot.slane %v1169_v41, %v1728_v20 }
 0x12e   :  { %1128 = vmatprep.mubr.bf16.mxu1 %v228_v47  ;;  %v1367_v0 = vpop.f32.mrb[7].mxu1  ;;  %1320 = vmatprep.subr.bf16.mxu0 %v1488_v51  ;;  %v1180_v47 = vrot.slane %v1165_v36, %v1728_v20 }
 0x12f   :  { %1342 = vmatprep.subr.bf16.mxu1 %v1489_v52 }
 0x130   :  { %1321 = vmatpush3.bf16.msra.mxu0 %v1490_v57  ;;  %v1172_v57 = vsub.s32 4, %v1725_v19 }
 0x131   :  { %1343 = vmatpush3.bf16.msra.mxu1 %v1491_v58  ;;  %1322 = vmatprep.subr.bf16.mxu0 %v1492_v61 }
 0x132   :  { %1344 = vmatprep.subr.bf16.mxu1 %v1493_v62 }
 0x134   :  { %1323 = vmatpush3.bf16.msra.mxu0 %v1494_v1 }
 0x135   :  { %1345 = vmatpush3.bf16.msra.mxu1 %v1495_v2  ;;  %1324 = vmatprep.subr.bf16.mxu0 %v1496_v3  ;;  %v1149_v3 = vrot.slane %v1136_v29, %v1731_v21 }
 0x136   :  { %1346 = vmatprep.subr.bf16.mxu1 %v1497_v4  ;;  %v1173_v4 = vrot.slane %v1160_v28, %v1172_v57 }
 0x138   :  { %1325 = vmatpush3.bf16.msra.mxu0 %v1498_v5 }
 0x139   :  { %1347 = vmatpush3.bf16.msra.mxu1 %v1499_v6  ;;  %1326 = vmatprep.subr.bf16.mxu0 %v1500_v7  ;;  %v1188_v7 = vrot.slane %v1173_v4, %v1728_v20 }
 0x13a   :  { %1348 = vmatprep.subr.bf16.mxu1 %v1501_v8 }
 0x13c   :  { %1327 = vmatpush3.bf16.msra.mxu0 %v1502_v9 }
 0x13d   :  { %1349 = vmatpush3.bf16.msra.mxu1 %v1503_v10  ;;  %1328 = vmatprep.subr.bf16.mxu0 %v1504_v11  ;;  %v1197_v10 = vstv %s1789_s8 }
 0x13e   :  { %1350 = vmatprep.subr.bf16.mxu1 %v1505_v12 }
 0x140   :  { %1329 = vmatpush3.bf16.msra.mxu0 %v1506_v13 }
 0x141   :  { %1351 = vmatpush3.bf16.msra.mxu1 %v1507_v14  ;;  %1330 = vmatprep.subr.bf16.mxu0 %v1508_v15 }
 0x142   :  { %1352 = vmatprep.subr.bf16.mxu1 %v1509_v16 }
 0x144   :  { %1331 = vmatpush3.bf16.msra.mxu0 %v1510_v17 }
 0x145   :  { %1353 = vmatpush3.bf16.msra.mxu1 %v1511_v18  ;;  %1332 = vmatprep.subr.bf16.mxu0 %v1512_v22 }
 0x146   :  { %1354 = vmatprep.subr.bf16.mxu1 %v1513_v24 }
 0x148   :  { %1333 = vmatpush3.bf16.msra.mxu0 %v1514_v25 }
 0x149   :  { %1355 = vmatpush3.bf16.msra.mxu1 %v1515_v26 }
 0x14b   :  { %1089 = vmatmul.mubr.bf16.vlgmr.msra.gmra.mrb[12].mxu0 %v1744_v50 }
 0x14c   :  { %1129 = vmatmul.mubr.bf16.vlgmr.msra.gmra.mrb[12].mxu1 %v1742_v45 }
 0x1fe   :  { %v1008_v30 = vpop.f32.mrb[8].mxu0 }
 0x1ff   :  { %v1049_v31 = vpop.f32.mrb[8].mxu1  ;;  %v1009_v32 = vadd.f32 %v1008_v30, %v1746_v53  ;;  %v1010_v34 = vpop.f32.mrb[9].mxu0 }
 0x200   :  { %v1051_v35 = vpop.f32.mrb[9].mxu1  ;;  %v1011_v37 = vadd.f32 %v1010_v34, %v1752_v55  ;;  %v1012_v39 = vpop.f32.mrb[10].mxu0 }
 0x201   :  { %v1053_v40 = vpop.f32.mrb[10].mxu1  ;;  %v1050_v42 = vadd.f32 %v1049_v31, %v1009_v32  ;;  %v1013_v43 = vpop.f32.mrb[11].mxu0 }
 0x202   :  { %v1054_v44 = vpop.f32.mrb[11].mxu1  ;;  %v1052_v45 = vadd.f32 %v1051_v35, %v1011_v37 }
 0x203   :  { %v1153_v46 = vadd.f32 %v1141_v33, %v1050_v42 }
 0x204   :  { %v1154_v48 = vadd.f32 %v1145_v38, %v1052_v45 }
 0x205   :  { %v1156_v50 = vmax.f32 %v1153_v46, 0.0 }
 0x206   :  { %v1157_v51 = vmax.f32 %v1154_v48, 0.0 }
 0x207   :  { %v1189_v52 = vmul.f32 %v1180_v47, %v1156_v50 }
 0x208   :  { %v1190_v53 = vmul.f32 %v1184_v49, %v1157_v51 }
 0x20a   :  { %v1192_v55 = vadd.f32 %v1190_v53, %v1189_v52 }
 0x21e   :  { %v1334_v23 = vpop.f32.mrb[12].mxu0 }
 0x21f   :  { %v1356_v56 = vpop.f32.mrb[12].mxu1  ;;  %v1335_v58 = vpop.f32.mrb[13].mxu0 }
 0x220   :  { %v1357_v59 = vpop.f32.mrb[13].mxu1  ;;  %v1336_v60 = vadd.f32 %v1335_v58, %v1334_v23  ;;  %v1337_v62 = vpop.f32.mrb[14].mxu0 }
 0x221   :  { %v1358_v61 = vadd.f32 %v1357_v59, %v1356_v56  ;;  %v1359_v63 = vpop.f32.mrb[14].mxu1  ;;  %v1338_v0 = vpop.f32.mrb[15].mxu0 }
 0x222   :  { %v1360_v1 = vpop.f32.mrb[15].mxu1  ;;  %v1091_v2 = vadd.f32 %v1336_v60, %v1748_v54 }
 0x224   :  { %v1131_v5 = vadd.f32 %v1358_v61, %v1091_v2 }
 0x226   :  { %v1155_v6 = vadd.f32 %v1149_v3, %v1131_v5 }
 0x228   :  { %v1158_v8 = vmax.f32 %v1155_v6, 0.0 }
 0x22a   :  { %v1191_v9 = vmul.f32 %v1188_v7, %v1158_v8 }
 0x22c   :  { %v1193_v19 = vadd.f32 %v1192_v55, %v1191_v9 }
 0x22e   :  { %1194 = vadd.xlane.f32.xlu0 %v1193_v19 }
 0x2bb   :  { %v1195_v11 = vpop.xlane.xlu0 %1194 }
 0x2bc   :  { %v1198_v12 = vadd.f32 %v1197_v10, %v1195_v11 }
 0x2be   :  { %1200 = vst.msk [vmem:[%s1790_s9] sm:$0xff] %vm1199_vm4, %v1198_v12 }
 0x2bf   :  { %1205 = vsyncpa [#allocation4], 1 }
 0x2c0   :  { %1206 = vsyncpa [#allocation6], 1 }
 0x2c1   :  { %1207 = vsyncpa [#allocation9], 1 }

</bundles_post_ra>
